<compile_context>
chip_gen: v7x
topology: tpu7x:2x2x1
jax: 0.10.0
libtpu: 0.0.40
codegen_flags: <defaults>
</compile_context>

<pallas_src>
import functools

import jax
import jax.numpy as jnp
from jax import lax
from jax.experimental import pallas as pl
from jax.experimental.pallas import tpu as pltpu

_TM_ROWS = 512                      # N-tile (per batch entry) for all kernels
_VMEM_LIMIT = 32 * 1024 * 1024      # leave headroom on v7x (64 MiB physical)


def _round_up(x, m):
    return ((x + m - 1) // m) * m


# --------------------------------------------------------------------------
# Fused kernel: 3-NN inverse-distance interpolation + first 1x1 conv layer
# (split weight, no HBM concat) + per-batch BatchNorm statistics.
# Grid: (B, Np // tn)  with  dimension_semantics = ("parallel", "arbitrary").
# --------------------------------------------------------------------------
def _first_layer_kernel(*refs, n_total, has_p1):
    if has_p1:
        (xyz1_ref, xyz2_ref, pts2_ref, p1_ref, wp1_ref, wi_ref, b_ref,
         y_ref, s1_ref, s2_ref) = refs
    else:
        (xyz1_ref, xyz2_ref, pts2_ref, wi_ref, b_ref,
         y_ref, s1_ref, s2_ref) = refs

    n_idx = pl.program_id(1)
    x1 = xyz1_ref[0]                       # [tn, C]   (channels-last)
    x2t = xyz2_ref[0]                      # [C, S]    (channels-first, resident)
    p2 = pts2_ref[0]                       # [S, D2]   (resident)
    tn, c = x1.shape
    s = x2t.shape[1]
    d2 = p2.shape[1]

    if s == 1:
        # torch: points2.repeat(1, N, 1)
        interp = jnp.broadcast_to(p2, (tn, d2))
    else:
        # Squared pairwise distances via VPU broadcast-FMAs (C is tiny, e.g. 3).
        # Guaranteed >= 0 -> f32 bit pattern is monotone as int32.
        d = jnp.zeros((tn, s), jnp.float32)
        for ci in range(c):
            diff = x1[:, ci:ci + 1] - x2t[ci:ci + 1, :]     # [tn,1]-[1,S]
            d = d + diff * diff

        # Pack distance bits (high) + column index (low) into one monotone
        # int32 key -> each of the 3 NN selections is a single cross-lane min.
        nb = max(1, (s - 1).bit_length())
        pos = lax.broadcasted_iota(jnp.int32, (tn, s), 1)
        dbits = pltpu.bitcast(d, jnp.int32)
        keys = ((dbits >> nb) << nb) | pos

        int_max = jnp.int32(2 ** 31 - 1)
        acc_w = jnp.zeros((tn, s), jnp.float32)             # unnormalized weights
        wsum = jnp.zeros((tn, 1), jnp.float32)
        # torch does dists.sort()[:, :, :3]; with S == 2 that yields 2 neighbors.
        for _ in range(min(3, s)):
            kmin = jnp.min(keys, axis=-1, keepdims=True)    # one XLU min / iter
            onehot = keys == kmin                           # unique (pos in key)
            m = pltpu.bitcast((kmin >> nb) << nb, jnp.float32)
            wk = pl.reciprocal(jnp.maximum(m, 1e-10), approx=True)
            acc_w = acc_w + wk * onehot.astype(jnp.float32)
            wsum = wsum + wk
            keys = jnp.where(onehot, int_max, keys)

        interp = jnp.dot(acc_w, p2, preferred_element_type=jnp.float32)
        interp = interp * pl.reciprocal(wsum, approx=True)

    # First layer: y = [points1, interp] @ [Wp1; Wi] + b  (bf16 MXU, f32 acc).
    y = jnp.dot(interp.astype(jnp.bfloat16), wi_ref[...],
                preferred_element_type=jnp.float32)
    if has_p1:
        y = y + jnp.dot(p1_ref[0], wp1_ref[...],
                        preferred_element_type=jnp.float32)
    y = y + b_ref[...]
    y_ref[0] = y.astype(y_ref.dtype)                        # bf16 activations

    # Per-batch BatchNorm statistics from the f32 accumulator (exclude pad rows).
    if n_total % tn:
        rows = n_idx * tn + lax.broadcasted_iota(jnp.int32, (tn, 1), 0)
        y = jnp.where(rows < n_total, y, 0.0)

    @pl.when(n_idx == 0)
    def _():
        s1_ref[...] = jnp.zeros_like(s1_ref)
        s2_ref[...] = jnp.zeros_like(s2_ref)

    s1_ref[...] += jnp.sum(y, axis=0, keepdims=True)[None]
    s2_ref[...] += jnp.sum(y * y, axis=0, keepdims=True)[None]


def first_layer(xyz1, xyz2, pts2, p1, wp1, wi, bias, *, n_total, tn):
    B, Np, C = xyz1.shape
    S = xyz2.shape[-1]
    D2 = pts2.shape[-1]
    cout = wi.shape[-1]
    has_p1 = p1 is not None

    in_specs = [
        pl.BlockSpec((1, tn, C), lambda b, n: (b, n, 0)),
        pl.BlockSpec((1, C, S), lambda b, n: (b, 0, 0)),     # resident over n
        pl.BlockSpec((1, S, D2), lambda b, n: (b, 0, 0)),    # resident over n
    ]
    inputs = [xyz1, xyz2, pts2]
    if has_p1:
        D1 = p1.shape[-1]
        in_specs += [pl.BlockSpec((1, tn, D1), lambda b, n: (b, n, 0)),
                     pl.BlockSpec((D1, cout), lambda b, n: (0, 0))]
        inputs += [p1, wp1]
    in_specs += [pl.BlockSpec((D2, cout), lambda b, n: (0, 0)),
                 pl.BlockSpec((1, cout), lambda b, n: (0, 0))]
    inputs += [wi, bias]

    kernel = functools.partial(_first_layer_kernel, n_total=n_total,
                               has_p1=has_p1)
    return pl.pallas_call(
        kernel,
        out_shape=(jax.ShapeDtypeStruct((B, Np, cout), jnp.bfloat16),
                   jax.ShapeDtypeStruct((B, 1, cout), jnp.float32),
                   jax.ShapeDtypeStruct((B, 1, cout), jnp.float32)),
        grid=(B, Np // tn),
        in_specs=in_specs,
        out_specs=(pl.BlockSpec((1, tn, cout), lambda b, n: (b, n, 0)),
                   pl.BlockSpec((1, 1, cout), lambda b, n: (b, 0, 0)),
                   pl.BlockSpec((1, 1, cout), lambda b, n: (b, 0, 0))),
        compiler_params=pltpu.CompilerParams(
            dimension_semantics=("parallel", "arbitrary"),
            vmem_limit_bytes=_VMEM_LIMIT),
    )(*inputs)


# --------------------------------------------------------------------------
# Middle layers: fused previous-layer BN+ReLU + matmul + per-batch BN stats.
# --------------------------------------------------------------------------
def _mm_stats_kernel(x_ref, w_ref, b_ref, scale_ref, shift_ref,
                     y_ref, s1_ref, s2_ref, *, n_total):
    n_idx = pl.program_id(1)
    tn = x_ref.shape[1]

    x = x_ref[0].astype(jnp.float32)                        # bf16 -> f32
    x = jnp.maximum(x * scale_ref[...] + shift_ref[...], 0.0)
    y = jnp.dot(x.astype(jnp.bfloat16), w_ref[...],
                preferred_element_type=jnp.float32) + b_ref[...]
    y_ref[0] = y.astype(y_ref.dtype)

    if n_total % tn:
        rows = n_idx * tn + lax.broadcasted_iota(jnp.int32, (tn, 1), 0)
        y = jnp.where(rows < n_total, y, 0.0)

    @pl.when(n_idx == 0)
    def _():
        s1_ref[...] = jnp.zeros_like(s1_ref)
        s2_ref[...] = jnp.zeros_like(s2_ref)

    s1_ref[...] += jnp.sum(y, axis=0, keepdims=True)[None]
    s2_ref[...] += jnp.sum(y * y, axis=0, keepdims=True)[None]


def mm_stats_layer(x, w, bias, scale, shift, *, n_total, tn):
    B, Np, cin = x.shape
    cout = w.shape[-1]
    kernel = functools.partial(_mm_stats_kernel, n_total=n_total)
    return pl.pallas_call(
        kernel,
        out_shape=(jax.ShapeDtypeStruct((B, Np, cout), jnp.bfloat16),
                   jax.ShapeDtypeStruct((B, 1, cout), jnp.float32),
                   jax.ShapeDtypeStruct((B, 1, cout), jnp.float32)),
        grid=(B, Np // tn),
        in_specs=[pl.BlockSpec((1, tn, cin), lambda b, n: (b, n, 0)),
                  pl.BlockSpec((cin, cout), lambda b, n: (0, 0)),
                  pl.BlockSpec((1, cout), lambda b, n: (0, 0)),
                  pl.BlockSpec((1, cin), lambda b, n: (0, 0)),
                  pl.BlockSpec((1, cin), lambda b, n: (0, 0))],
        out_specs=(pl.BlockSpec((1, tn, cout), lambda b, n: (b, n, 0)),
                   pl.BlockSpec((1, 1, cout), lambda b, n: (b, 0, 0)),
                   pl.BlockSpec((1, 1, cout), lambda b, n: (b, 0, 0))),
        compiler_params=pltpu.CompilerParams(
            dimension_semantics=("parallel", "arbitrary"),
            vmem_limit_bytes=_VMEM_LIMIT),
    )(x, w, bias, scale, shift)


# --------------------------------------------------------------------------
# Last layer apply: folded BN affine + ReLU.
# --------------------------------------------------------------------------
def _affine_relu_kernel(x_ref, scale_ref, shift_ref, o_ref):
    x = x_ref[0].astype(jnp.float32)
    o_ref[0] = jnp.maximum(x * scale_ref[...] + shift_ref[...], 0.0)


def affine_relu_layer(x, scale, shift, *, tn):
    B, Np, c = x.shape
    return pl.pallas_call(
        _affine_relu_kernel,
        out_shape=jax.ShapeDtypeStruct((B, Np, c), jnp.float32),
        grid=(B, Np // tn),
        in_specs=[pl.BlockSpec((1, tn, c), lambda b, n: (b, n, 0)),
                  pl.BlockSpec((1, c), lambda b, n: (0, 0)),
                  pl.BlockSpec((1, c), lambda b, n: (0, 0))],
        out_specs=pl.BlockSpec((1, tn, c), lambda b, n: (b, n, 0)),
        compiler_params=pltpu.CompilerParams(
            dimension_semantics=("parallel", "parallel"),
            vmem_limit_bytes=_VMEM_LIMIT),
    )(x, scale, shift)


def _bn_scale_shift(s1, s2, g, beta, m_total):
    # Reduce per-batch partials, fold training-mode BatchNorm1d into an affine.
    s1 = jnp.sum(s1, axis=0)                                 # [1, Cout]
    s2 = jnp.sum(s2, axis=0)
    mean = s1 / m_total
    var = jnp.maximum(s2 / m_total - mean * mean, 0.0)       # biased variance
    rstd = lax.rsqrt(var + 1e-5)
    scale = g * rstd
    shift = beta - mean * scale
    return scale, shift


# --------------------------------------------------------------------------
# Module forward (wrapper glue in plain JAX)
# --------------------------------------------------------------------------
@jax.jit
def pointnet_fp_forward(params, xyz1, xyz2, points1, points2):
    """PyTorch layout: xyz1 [B,C,N], xyz2 [B,C,S], points1 [B,D1,N] | None,
    points2 [B,D2,S].  Returns [B, D', N] (training-mode BatchNorm)."""
    B, _, N = xyz1.shape

    if N > _TM_ROWS:
        tn = _TM_ROWS
        Np = _round_up(N, tn)
    else:
        tn = Np = N

    def pad_n(a):
        return jnp.pad(a, ((0, 0), (0, Np - N), (0, 0))) if Np != N else a

    xyz1_bnc = pad_n(jnp.transpose(xyz1, (0, 2, 1)).astype(jnp.float32))
    pts2_bsd = jnp.transpose(points2, (0, 2, 1)).astype(jnp.float32)
    xyz2_f = xyz2.astype(jnp.float32)

    w0, b0, g0, beta0 = params[0]
    if points1 is not None:
        D1 = points1.shape[1]
        # TODO(synk): consume points1 channels-first in-kernel to drop this
        # XLA transpose pass.
        p1 = pad_n(jnp.transpose(points1, (0, 2, 1)).astype(jnp.bfloat16))
        wp1 = w0[:D1].astype(jnp.bfloat16)
        wi = w0[D1:].astype(jnp.bfloat16)
    else:
        p1, wp1 = None, None
        wi = w0.astype(jnp.bfloat16)

    # Fused: interpolation + split-weight first layer + per-batch BN stats.
    y, s1, s2 = first_layer(xyz1_bnc, xyz2_f, pts2_bsd, p1, wp1, wi, b0,
                            n_total=N, tn=tn)
    scale, shift = _bn_scale_shift(s1, s2, g0, beta0, B * N)

    # Layer-k BN+ReLU fused into layer-(k+1)'s matmul kernel.
    for (w, b, g, beta) in params[1:]:
        y, s1, s2 = mm_stats_layer(y, w.astype(jnp.bfloat16), b, scale, shift,
                                   n_total=N, tn=tn)
        scale, shift = _bn_scale_shift(s1, s2, g, beta, B * N)

    out = affine_relu_layer(y, scale, shift, tn=tn)
    if Np != N:
        out = out[:, :N, :]
    # TODO(synk): emit [B, D', N] directly via an in-kernel transpose.
    return jnp.transpose(out, (0, 2, 1))                     # [B, D', N]


# --------------------------------------------------------------------------
# Deterministic parameter init (Conv1d k=1 weights stored as [Cin, Cout])
# --------------------------------------------------------------------------
def init_params(key, in_channel, mlp):
    params = []
    last = in_channel
    for out_ch in mlp:
        key, k1, k2, k3, k4 = jax.random.split(key, 5)
        w = 0.1 * jax.random.normal(k1, (last, out_ch), jnp.float32)
        b = 0.1 * jax.random.normal(k2, (1, out_ch), jnp.float32)
        g = 1.0 + 0.1 * jax.random.normal(k3, (1, out_ch), jnp.float32)
        beta = 0.1 * jax.random.normal(k4, (1, out_ch), jnp.float32)
        params.append((w, b, g, beta))
        last = out_ch
    return params


# --------------------------------------------------------------------------
# Pure-JAX f32 reference (mirrors the PyTorch forward) for a sanity check
# --------------------------------------------------------------------------
def reference_forward(params, xyz1, xyz2, points1, points2):
    xyz1p = jnp.transpose(xyz1, (0, 2, 1))
    xyz2p = jnp.transpose(xyz2, (0, 2, 1))
    pts2p = jnp.transpose(points2, (0, 2, 1))
    B, N, _ = xyz1p.shape
    S = xyz2p.shape[1]
    if S == 1:
        interp = jnp.broadcast_to(pts2p, (B, N, pts2p.shape[-1]))
    else:
        d = (jnp.sum(xyz1p ** 2, -1, keepdims=True)
             - 2.0 * jnp.einsum('bnc,bsc->bns', xyz1p, xyz2p)
             + jnp.sum(xyz2p ** 2, -1)[:, None, :])
        idx = jnp.argsort(d, axis=-1)[:, :, :3]
        dk = jnp.maximum(jnp.take_along_axis(d, idx, axis=-1), 1e-10)
        w = 1.0 / dk
        w = w / jnp.sum(w, -1, keepdims=True)
        gathered = jax.vmap(lambda p, i: p[i])(pts2p, idx)
        interp = jnp.sum(gathered * w[..., None], axis=2)
    if points1 is not None:
        x = jnp.concatenate([jnp.transpose(points1, (0, 2, 1)), interp], axis=-1)
    else:
        x = interp
    for (wgt, b, g, beta) in params:
        y = jnp.einsum('bnd,dc->bnc', x, wgt) + b[0]
        mean = jnp.mean(y, axis=(0, 1), keepdims=True)
        var = jnp.mean((y - mean) ** 2, axis=(0, 1), keepdims=True)
        x = jnp.maximum(g[0] * (y - mean) * lax.rsqrt(var + 1e-5) + beta[0], 0.0)
    return jnp.transpose(x, (0, 2, 1))


if __name__ == "__main__":
    B, C, N, S = 2, 3, 16, 8
    D1, D2 = 4, 8
    mlp = [32, 16]
    in_channel = D1 + D2

    key = jax.random.PRNGKey(0)
    kx1, kx2, kp1, kp2, kparam = jax.random.split(key, 5)
    xyz1 = jax.random.uniform(kx1, (B, C, N), jnp.float32)
    xyz2 = jax.random.uniform(kx2, (B, C, S), jnp.float32)
    points1 = jax.random.normal(kp1, (B, D1, N), jnp.float32)
    points2 = jax.random.normal(kp2, (B, D2, S), jnp.float32)

    params = init_params(kparam, in_channel, mlp)

    out = pointnet_fp_forward(params, xyz1, xyz2, points1, points2)
    out = jax.block_until_ready(out)

    ref = jax.block_until_ready(
        reference_forward(params, xyz1, xyz2, points1, points2))

    assert out.shape == (B, mlp[-1], N), out.shape
    assert jnp.all(jnp.isfinite(out))
    # bf16 MXU operands + bf16 inter-layer activations (per perf review) ->
    # bf16-level tolerance against the pure-f32 reference.
    assert jnp.allclose(out, ref, atol=3e-2, rtol=3e-2), \
        float(jnp.max(jnp.abs(out - ref)))

    print("KERNEL_OK")
</pallas_src>

<mosaic_0001>
module attributes {stable_mosaic.version = 11 : i64} {
  func.func @_first_layer_kernel(%arg0: i32, %arg1: i32, %arg2: memref<1x16x3xf32, #tpu.memory_space<vmem>>, %arg3: memref<1x3x8xf32, #tpu.memory_space<vmem>>, %arg4: memref<1x8x8xf32, #tpu.memory_space<vmem>>, %arg5: memref<1x16x4xbf16, #tpu.memory_space<vmem>>, %arg6: memref<4x32xbf16, #tpu.memory_space<vmem>>, %arg7: memref<8x32xbf16, #tpu.memory_space<vmem>>, %arg8: memref<1x32xf32, #tpu.memory_space<vmem>>, %arg9: memref<1x16x32xbf16, #tpu.memory_space<vmem>>, %arg10: memref<1x1x32xf32, #tpu.memory_space<vmem>>, %arg11: memref<1x1x32xf32, #tpu.memory_space<vmem>>) attributes {dimension_semantics = [#tpu.dimension_semantics<parallel>, #tpu.dimension_semantics<arbitrary>], iteration_bounds = array<i64: 2, 1>, scalar_prefetch = 0 : i64, scratch_operands = 0 : i64, tpu.core_type = #tpu.core_type<tc>, window_params = [{transform_indices = @transform_0, window_bounds = array<i64: 1, 16, 3>}, {transform_indices = @transform_1, window_bounds = array<i64: 1, 3, 8>}, {transform_indices = @transform_2, window_bounds = array<i64: 1, 8, 8>}, {transform_indices = @transform_3, window_bounds = array<i64: 1, 16, 4>}, {pipeline_mode = #tpu.pipeline_mode<synchronous>, transform_indices = @transform_4, window_bounds = array<i64: 4, 32>}, {pipeline_mode = #tpu.pipeline_mode<synchronous>, transform_indices = @transform_5, window_bounds = array<i64: 8, 32>}, {pipeline_mode = #tpu.pipeline_mode<synchronous>, transform_indices = @transform_6, window_bounds = array<i64: 1, 32>}, {transform_indices = @transform_7, window_bounds = array<i64: 1, 16, 32>}, {transform_indices = @transform_8, window_bounds = array<i64: 1, 1, 32>}, {transform_indices = @transform_9, window_bounds = array<i64: 1, 1, 32>}]} {
    %c0 = arith.constant 0 : index
    %c0_0 = arith.constant 0 : index
    %c0_1 = arith.constant 0 : index
    %0 = vector.load %arg2[%c0, %c0_0, %c0_1] : memref<1x16x3xf32, #tpu.memory_space<vmem>>, vector<1x16x3xf32>
    %1 = vector.shape_cast %0 : vector<1x16x3xf32> to vector<16x3xf32>
    %c0_2 = arith.constant 0 : index
    %c0_3 = arith.constant 0 : index
    %c0_4 = arith.constant 0 : index
    %2 = vector.load %arg3[%c0_2, %c0_3, %c0_4] : memref<1x3x8xf32, #tpu.memory_space<vmem>>, vector<1x3x8xf32>
    %3 = vector.shape_cast %2 : vector<1x3x8xf32> to vector<3x8xf32>
    %c0_5 = arith.constant 0 : index
    %c0_6 = arith.constant 0 : index
    %c0_7 = arith.constant 0 : index
    %4 = vector.load %arg4[%c0_5, %c0_6, %c0_7] : memref<1x8x8xf32, #tpu.memory_space<vmem>>, vector<1x8x8xf32>
    %5 = vector.shape_cast %4 : vector<1x8x8xf32> to vector<8x8xf32>
    %cst = arith.constant 0.000000e+00 : f32
    %6 = vector.broadcast %cst : f32 to vector<16x8xf32>
    %7 = vector.extract_strided_slice %1 {offsets = [0, 0], sizes = [16, 1], strides = [1, 1]} : vector<16x3xf32> to vector<16x1xf32>
    %8 = vector.extract_strided_slice %3 {offsets = [0, 0], sizes = [1, 8], strides = [1, 1]} : vector<3x8xf32> to vector<1x8xf32>
    %9 = vector.broadcast %7 : vector<16x1xf32> to vector<16x8xf32>
    %10 = vector.broadcast %8 : vector<1x8xf32> to vector<16x8xf32>
    %11 = arith.subf %9, %10 : vector<16x8xf32>
    %12 = arith.mulf %11, %11 : vector<16x8xf32>
    %13 = arith.addf %6, %12 : vector<16x8xf32>
    %14 = vector.extract_strided_slice %1 {offsets = [0, 1], sizes = [16, 1], strides = [1, 1]} : vector<16x3xf32> to vector<16x1xf32>
    %15 = vector.extract_strided_slice %3 {offsets = [1, 0], sizes = [1, 8], strides = [1, 1]} : vector<3x8xf32> to vector<1x8xf32>
    %16 = vector.broadcast %14 : vector<16x1xf32> to vector<16x8xf32>
    %17 = vector.broadcast %15 : vector<1x8xf32> to vector<16x8xf32>
    %18 = arith.subf %16, %17 : vector<16x8xf32>
    %19 = arith.mulf %18, %18 : vector<16x8xf32>
    %20 = arith.addf %13, %19 : vector<16x8xf32>
    %21 = vector.extract_strided_slice %1 {offsets = [0, 2], sizes = [16, 1], strides = [1, 1]} : vector<16x3xf32> to vector<16x1xf32>
    %22 = vector.extract_strided_slice %3 {offsets = [2, 0], sizes = [1, 8], strides = [1, 1]} : vector<3x8xf32> to vector<1x8xf32>
    %23 = vector.broadcast %21 : vector<16x1xf32> to vector<16x8xf32>
    %24 = vector.broadcast %22 : vector<1x8xf32> to vector<16x8xf32>
    %25 = arith.subf %23, %24 : vector<16x8xf32>
    %26 = arith.mulf %25, %25 : vector<16x8xf32>
    %27 = arith.addf %20, %26 : vector<16x8xf32>
    %28 = tpu.iota {dimensions = array<i32: 1>} : vector<16x8xi32>
    %29 = tpu.bitcast %27 : vector<16x8xf32> -> vector<16x8xi32>
    %c3_i32 = arith.constant 3 : i32
    %30 = vector.broadcast %c3_i32 : i32 to vector<16x8xi32>
    %31 = arith.shrsi %29, %30 : vector<16x8xi32>
    %c3_i32_8 = arith.constant 3 : i32
    %32 = vector.broadcast %c3_i32_8 : i32 to vector<16x8xi32>
    %33 = arith.shli %31, %32 : vector<16x8xi32>
    %34 = arith.ori %33, %28 : vector<16x8xi32>
    %cst_9 = arith.constant 0.000000e+00 : f32
    %35 = vector.broadcast %cst_9 : f32 to vector<16x8xf32>
    %cst_10 = arith.constant 0.000000e+00 : f32
    %36 = vector.broadcast %cst_10 : f32 to vector<16x1xf32>
    %cst_11 = arith.constant dense<2147483647> : vector<16xi32>
    %37 = vector.multi_reduction <minsi>, %34, %cst_11 [1] : vector<16x8xi32> to vector<16xi32>
    %38 = vector.shape_cast %37 : vector<16xi32> to vector<16x1xi32>
    %39 = vector.broadcast %38 : vector<16x1xi32> to vector<16x8xi32>
    %40 = arith.cmpi eq, %34, %39 : vector<16x8xi32>
    %c3_i32_12 = arith.constant 3 : i32
    %41 = vector.broadcast %c3_i32_12 : i32 to vector<16x1xi32>
    %42 = arith.shrsi %38, %41 : vector<16x1xi32>
    %c3_i32_13 = arith.constant 3 : i32
    %43 = vector.broadcast %c3_i32_13 : i32 to vector<16x1xi32>
    %44 = arith.shli %42, %43 : vector<16x1xi32>
    %45 = tpu.bitcast %44 : vector<16x1xi32> -> vector<16x1xf32>
    %cst_14 = arith.constant 1.000000e-10 : f32
    %46 = vector.broadcast %cst_14 : f32 to vector<16x1xf32>
    %47 = arith.maximumf %45, %46 : vector<16x1xf32>
    %48 = tpu.reciprocal %47 {approx = true} : vector<16x1xf32> -> vector<16x1xf32>
    %49 = arith.extui %40 : vector<16x8xi1> to vector<16x8xi32>
    %50 = arith.sitofp %49 : vector<16x8xi32> to vector<16x8xf32>
    %51 = vector.broadcast %48 : vector<16x1xf32> to vector<16x8xf32>
    %52 = arith.mulf %51, %50 : vector<16x8xf32>
    %53 = arith.addf %35, %52 : vector<16x8xf32>
    %54 = arith.addf %36, %48 : vector<16x1xf32>
    %c2147483647_i32 = arith.constant 2147483647 : i32
    %55 = vector.broadcast %c2147483647_i32 : i32 to vector<16x8xi32>
    %56 = arith.select %40, %55, %34 : vector<16x8xi1>, vector<16x8xi32>
    %cst_15 = arith.constant dense<2147483647> : vector<16xi32>
    %57 = vector.multi_reduction <minsi>, %56, %cst_15 [1] : vector<16x8xi32> to vector<16xi32>
    %58 = vector.shape_cast %57 : vector<16xi32> to vector<16x1xi32>
    %59 = vector.broadcast %58 : vector<16x1xi32> to vector<16x8xi32>
    %60 = arith.cmpi eq, %56, %59 : vector<16x8xi32>
    %c3_i32_16 = arith.constant 3 : i32
    %61 = vector.broadcast %c3_i32_16 : i32 to vector<16x1xi32>
    %62 = arith.shrsi %58, %61 : vector<16x1xi32>
    %c3_i32_17 = arith.constant 3 : i32
    %63 = vector.broadcast %c3_i32_17 : i32 to vector<16x1xi32>
    %64 = arith.shli %62, %63 : vector<16x1xi32>
    %65 = tpu.bitcast %64 : vector<16x1xi32> -> vector<16x1xf32>
    %cst_18 = arith.constant 1.000000e-10 : f32
    %66 = vector.broadcast %cst_18 : f32 to vector<16x1xf32>
    %67 = arith.maximumf %65, %66 : vector<16x1xf32>
    %68 = tpu.reciprocal %67 {approx = true} : vector<16x1xf32> -> vector<16x1xf32>
    %69 = arith.extui %60 : vector<16x8xi1> to vector<16x8xi32>
    %70 = arith.sitofp %69 : vector<16x8xi32> to vector<16x8xf32>
    %71 = vector.broadcast %68 : vector<16x1xf32> to vector<16x8xf32>
    %72 = arith.mulf %71, %70 : vector<16x8xf32>
    %73 = arith.addf %53, %72 : vector<16x8xf32>
    %74 = arith.addf %54, %68 : vector<16x1xf32>
    %c2147483647_i32_19 = arith.constant 2147483647 : i32
    %75 = vector.broadcast %c2147483647_i32_19 : i32 to vector<16x8xi32>
    %76 = arith.select %60, %75, %56 : vector<16x8xi1>, vector<16x8xi32>
    %cst_20 = arith.constant dense<2147483647> : vector<16xi32>
    %77 = vector.multi_reduction <minsi>, %76, %cst_20 [1] : vector<16x8xi32> to vector<16xi32>
    %78 = vector.shape_cast %77 : vector<16xi32> to vector<16x1xi32>
    %79 = vector.broadcast %78 : vector<16x1xi32> to vector<16x8xi32>
    %80 = arith.cmpi eq, %76, %79 : vector<16x8xi32>
    %c3_i32_21 = arith.constant 3 : i32
    %81 = vector.broadcast %c3_i32_21 : i32 to vector<16x1xi32>
    %82 = arith.shrsi %78, %81 : vector<16x1xi32>
    %c3_i32_22 = arith.constant 3 : i32
    %83 = vector.broadcast %c3_i32_22 : i32 to vector<16x1xi32>
    %84 = arith.shli %82, %83 : vector<16x1xi32>
    %85 = tpu.bitcast %84 : vector<16x1xi32> -> vector<16x1xf32>
    %cst_23 = arith.constant 1.000000e-10 : f32
    %86 = vector.broadcast %cst_23 : f32 to vector<16x1xf32>
    %87 = arith.maximumf %85, %86 : vector<16x1xf32>
    %88 = tpu.reciprocal %87 {approx = true} : vector<16x1xf32> -> vector<16x1xf32>
    %89 = arith.extui %80 : vector<16x8xi1> to vector<16x8xi32>
    %90 = arith.sitofp %89 : vector<16x8xi32> to vector<16x8xf32>
    %91 = vector.broadcast %88 : vector<16x1xf32> to vector<16x8xf32>
    %92 = arith.mulf %91, %90 : vector<16x8xf32>
    %93 = arith.addf %73, %92 : vector<16x8xf32>
    %94 = arith.addf %74, %88 : vector<16x1xf32>
    %cst_24 = arith.constant dense<0.000000e+00> : vector<16x8xf32>
    %95 = tpu.matmul %93, %5, %cst_24 {dimension_numbers = #tpu.dot_dimension_numbers<[1], [0], [0], [1], [0, 0, 1, 1], [], []>} : vector<16x8xf32>, vector<8x8xf32>, vector<16x8xf32> -> vector<16x8xf32>
    %96 = tpu.reciprocal %94 {approx = true} : vector<16x1xf32> -> vector<16x1xf32>
    %97 = vector.broadcast %96 : vector<16x1xf32> to vector<16x8xf32>
    %98 = arith.mulf %95, %97 : vector<16x8xf32>
    %99 = arith.truncf %98 : vector<16x8xf32> to vector<16x8xbf16>
    %c0_25 = arith.constant 0 : index
    %c0_26 = arith.constant 0 : index
    %100 = vector.load %arg7[%c0_25, %c0_26] : memref<8x32xbf16, #tpu.memory_space<vmem>>, vector<8x32xbf16>
    %cst_27 = arith.constant dense<0.000000e+00> : vector<16x32xf32>
    %101 = tpu.matmul %99, %100, %cst_27 {dimension_numbers = #tpu.dot_dimension_numbers<[1], [0], [0], [1], [0, 0, 1, 1], [], []>} : vector<16x8xbf16>, vector<8x32xbf16>, vector<16x32xf32> -> vector<16x32xf32>
    %c0_28 = arith.constant 0 : index
    %c0_29 = arith.constant 0 : index
    %c0_30 = arith.constant 0 : index
    %102 = vector.load %arg5[%c0_28, %c0_29, %c0_30] : memref<1x16x4xbf16, #tpu.memory_space<vmem>>, vector<1x16x4xbf16>
    %103 = vector.shape_cast %102 : vector<1x16x4xbf16> to vector<16x4xbf16>
    %c0_31 = arith.constant 0 : index
    %c0_32 = arith.constant 0 : index
    %104 = vector.load %arg6[%c0_31, %c0_32] : memref<4x32xbf16, #tpu.memory_space<vmem>>, vector<4x32xbf16>
    %cst_33 = arith.constant dense<0.000000e+00> : vector<16x32xf32>
    %105 = tpu.matmul %103, %104, %cst_33 {dimension_numbers = #tpu.dot_dimension_numbers<[1], [0], [0], [1], [0, 0, 1, 1], [], []>} : vector<16x4xbf16>, vector<4x32xbf16>, vector<16x32xf32> -> vector<16x32xf32>
    %106 = arith.addf %101, %105 : vector<16x32xf32>
    %c0_34 = arith.constant 0 : index
    %c0_35 = arith.constant 0 : index
    %107 = vector.load %arg8[%c0_34, %c0_35] : memref<1x32xf32, #tpu.memory_space<vmem>>, vector<1x32xf32>
    %108 = vector.broadcast %107 : vector<1x32xf32> to vector<16x32xf32>
    %109 = arith.addf %106, %108 : vector<16x32xf32>
    %110 = arith.truncf %109 : vector<16x32xf32> to vector<16x32xbf16>
    %c0_36 = arith.constant 0 : index
    %c0_37 = arith.constant 0 : index
    %c0_38 = arith.constant 0 : index
    %111 = vector.load %arg9[%c0_36, %c0_37, %c0_38] : memref<1x16x32xbf16, #tpu.memory_space<vmem>>, vector<1x16x32xbf16>
    %112 = vector.shape_cast %111 : vector<1x16x32xbf16> to vector<16x32xbf16>
    %113 = vector.shape_cast %110 : vector<16x32xbf16> to vector<1x16x32xbf16>
    tpu.vector_store %arg9[%c0_36, %c0_37, %c0_38], %113 {strides = array<i32>} : memref<1x16x32xbf16, #tpu.memory_space<vmem>>, vector<1x16x32xbf16>,
    %c0_i32 = arith.constant 0 : i32
    %114 = arith.cmpi eq, %arg1, %c0_i32 : i32
    %115 = arith.extui %114 : i1 to i32
    %c0_i32_39 = arith.constant 0 : i32
    %116 = arith.cmpi ne, %115, %c0_i32_39 : i32
    scf.if %116 {
      %cst_54 = arith.constant 0.000000e+00 : f32
      %130 = vector.broadcast %cst_54 : f32 to vector<1x1x32xf32>
      %c0_55 = arith.constant 0 : index
      %c0_56 = arith.constant 0 : index
      %c0_57 = arith.constant 0 : index
      %131 = vector.load %arg10[%c0_55, %c0_56, %c0_57] : memref<1x1x32xf32, #tpu.memory_space<vmem>>, vector<1x1x32xf32>
      tpu.vector_store %arg10[%c0_55, %c0_56, %c0_57], %130 {strides = array<i32>} : memref<1x1x32xf32, #tpu.memory_space<vmem>>, vector<1x1x32xf32>,
      %cst_58 = arith.constant 0.000000e+00 : f32
      %132 = vector.broadcast %cst_58 : f32 to vector<1x1x32xf32>
      %c0_59 = arith.constant 0 : index
      %c0_60 = arith.constant 0 : index
      %c0_61 = arith.constant 0 : index
      %133 = vector.load %arg11[%c0_59, %c0_60, %c0_61] : memref<1x1x32xf32, #tpu.memory_space<vmem>>, vector<1x1x32xf32>
      tpu.vector_store %arg11[%c0_59, %c0_60, %c0_61], %132 {strides = array<i32>} : memref<1x1x32xf32, #tpu.memory_space<vmem>>, vector<1x1x32xf32>,
    } else {
    }
    %c0_40 = arith.constant 0 : index
    %c0_41 = arith.constant 0 : index
    %c0_42 = arith.constant 0 : index
    %117 = vector.load %arg10[%c0_40, %c0_41, %c0_42] : memref<1x1x32xf32, #tpu.memory_space<vmem>>, vector<1x1x32xf32>
    %cst_43 = arith.constant dense<0.000000e+00> : vector<32xf32>
    %118 = vector.multi_reduction <add>, %109, %cst_43 [0] : vector<16x32xf32> to vector<32xf32>
    %119 = vector.shape_cast %118 : vector<32xf32> to vector<1x32xf32>
    %120 = vector.shape_cast %119 : vector<1x32xf32> to vector<1x1x32xf32>
    %121 = arith.addf %117, %120 : vector<1x1x32xf32>
    %c0_44 = arith.constant 0 : index
    %c0_45 = arith.constant 0 : index
    %c0_46 = arith.constant 0 : index
    %122 = vector.load %arg10[%c0_44, %c0_45, %c0_46] : memref<1x1x32xf32, #tpu.memory_space<vmem>>, vector<1x1x32xf32>
    tpu.vector_store %arg10[%c0_44, %c0_45, %c0_46], %121 {strides = array<i32>} : memref<1x1x32xf32, #tpu.memory_space<vmem>>, vector<1x1x32xf32>,
    %c0_47 = arith.constant 0 : index
    %c0_48 = arith.constant 0 : index
    %c0_49 = arith.constant 0 : index
    %123 = vector.load %arg11[%c0_47, %c0_48, %c0_49] : memref<1x1x32xf32, #tpu.memory_space<vmem>>, vector<1x1x32xf32>
    %124 = arith.mulf %109, %109 : vector<16x32xf32>
    %cst_50 = arith.constant dense<0.000000e+00> : vector<32xf32>
    %125 = vector.multi_reduction <add>, %124, %cst_50 [0] : vector<16x32xf32> to vector<32xf32>
    %126 = vector.shape_cast %125 : vector<32xf32> to vector<1x32xf32>
    %127 = vector.shape_cast %126 : vector<1x32xf32> to vector<1x1x32xf32>
    %128 = arith.addf %123, %127 : vector<1x1x32xf32>
    %c0_51 = arith.constant 0 : index
    %c0_52 = arith.constant 0 : index
    %c0_53 = arith.constant 0 : index
    %129 = vector.load %arg11[%c0_51, %c0_52, %c0_53] : memref<1x1x32xf32, #tpu.memory_space<vmem>>, vector<1x1x32xf32>
    tpu.vector_store %arg11[%c0_51, %c0_52, %c0_53], %128 {strides = array<i32>} : memref<1x1x32xf32, #tpu.memory_space<vmem>>, vector<1x1x32xf32>,
    return
  }
  func.func @transform_0(%arg0: i32, %arg1: i32) -> (i32, i32, i32) {
    %c0_i32 = arith.constant 0 : i32
    %c0_i32_0 = arith.constant 0 : i32
    return %arg0, %arg1, %c0_i32 : i32, i32, i32
  }
  func.func @transform_1(%arg0: i32, %arg1: i32) -> (i32, i32, i32) {
    %c0_i32 = arith.constant 0 : i32
    %c0_i32_0 = arith.constant 0 : i32
    %c0_i32_1 = arith.constant 0 : i32
    return %arg0, %c0_i32, %c0_i32_0 : i32, i32, i32
  }
  func.func @transform_2(%arg0: i32, %arg1: i32) -> (i32, i32, i32) {
    %c0_i32 = arith.constant 0 : i32
    %c0_i32_0 = arith.constant 0 : i32
    %c0_i32_1 = arith.constant 0 : i32
    return %arg0, %c0_i32, %c0_i32_0 : i32, i32, i32
  }
  func.func @transform_3(%arg0: i32, %arg1: i32) -> (i32, i32, i32) {
    %c0_i32 = arith.constant 0 : i32
    %c0_i32_0 = arith.constant 0 : i32
    return %arg0, %arg1, %c0_i32 : i32, i32, i32
  }
  func.func @transform_4(%arg0: i32, %arg1: i32) -> (i32, i32) {
    %c0_i32 = arith.constant 0 : i32
    %c0_i32_0 = arith.constant 0 : i32
    %c0_i32_1 = arith.constant 0 : i32
    return %c0_i32, %c0_i32_0 : i32, i32
  }
  func.func @transform_5(%arg0: i32, %arg1: i32) -> (i32, i32) {
    %c0_i32 = arith.constant 0 : i32
    %c0_i32_0 = arith.constant 0 : i32
    %c0_i32_1 = arith.constant 0 : i32
    return %c0_i32, %c0_i32_0 : i32, i32
  }
  func.func @transform_6(%arg0: i32, %arg1: i32) -> (i32, i32) {
    %c0_i32 = arith.constant 0 : i32
    %c0_i32_0 = arith.constant 0 : i32
    %c0_i32_1 = arith.constant 0 : i32
    return %c0_i32, %c0_i32_0 : i32, i32
  }
  func.func @transform_7(%arg0: i32, %arg1: i32) -> (i32, i32, i32) {
    %c0_i32 = arith.constant 0 : i32
    %c0_i32_0 = arith.constant 0 : i32
    return %arg0, %arg1, %c0_i32 : i32, i32, i32
  }
  func.func @transform_8(%arg0: i32, %arg1: i32) -> (i32, i32, i32) {
    %c0_i32 = arith.constant 0 : i32
    %c0_i32_0 = arith.constant 0 : i32
    %c0_i32_1 = arith.constant 0 : i32
    return %arg0, %c0_i32, %c0_i32_0 : i32, i32, i32
  }
  func.func @transform_9(%arg0: i32, %arg1: i32) -> (i32, i32, i32) {
    %c0_i32 = arith.constant 0 : i32
    %c0_i32_0 = arith.constant 0 : i32
    %c0_i32_1 = arith.constant 0 : i32
    return %arg0, %c0_i32, %c0_i32_0 : i32, i32, i32
  }
}

module attributes {stable_mosaic.version = 11 : i64} {
  func.func @_mm_stats_kernel(%arg0: i32, %arg1: i32, %arg2: memref<1x16x32xbf16, #tpu.memory_space<vmem>>, %arg3: memref<32x16xbf16, #tpu.memory_space<vmem>>, %arg4: memref<1x16xf32, #tpu.memory_space<vmem>>, %arg5: memref<1x32xf32, #tpu.memory_space<vmem>>, %arg6: memref<1x32xf32, #tpu.memory_space<vmem>>, %arg7: memref<1x16x16xbf16, #tpu.memory_space<vmem>>, %arg8: memref<1x1x16xf32, #tpu.memory_space<vmem>>, %arg9: memref<1x1x16xf32, #tpu.memory_space<vmem>>) attributes {dimension_semantics = [#tpu.dimension_semantics<parallel>, #tpu.dimension_semantics<arbitrary>], iteration_bounds = array<i64: 2, 1>, scalar_prefetch = 0 : i64, scratch_operands = 0 : i64, tpu.core_type = #tpu.core_type<tc>, window_params = [{transform_indices = @transform_0, window_bounds = array<i64: 1, 16, 32>}, {pipeline_mode = #tpu.pipeline_mode<synchronous>, transform_indices = @transform_1, window_bounds = array<i64: 32, 16>}, {pipeline_mode = #tpu.pipeline_mode<synchronous>, transform_indices = @transform_2, window_bounds = array<i64: 1, 16>}, {pipeline_mode = #tpu.pipeline_mode<synchronous>, transform_indices = @transform_3, window_bounds = array<i64: 1, 32>}, {pipeline_mode = #tpu.pipeline_mode<synchronous>, transform_indices = @transform_4, window_bounds = array<i64: 1, 32>}, {transform_indices = @transform_5, window_bounds = array<i64: 1, 16, 16>}, {transform_indices = @transform_6, window_bounds = array<i64: 1, 1, 16>}, {transform_indices = @transform_7, window_bounds = array<i64: 1, 1, 16>}]} {
    %c0 = arith.constant 0 : index
    %c0_0 = arith.constant 0 : index
    %c0_1 = arith.constant 0 : index
    %0 = vector.load %arg2[%c0, %c0_0, %c0_1] : memref<1x16x32xbf16, #tpu.memory_space<vmem>>, vector<1x16x32xbf16>
    %1 = vector.shape_cast %0 : vector<1x16x32xbf16> to vector<16x32xbf16>
    %2 = arith.extf %1 : vector<16x32xbf16> to vector<16x32xf32>
    %c0_2 = arith.constant 0 : index
    %c0_3 = arith.constant 0 : index
    %3 = vector.load %arg5[%c0_2, %c0_3] : memref<1x32xf32, #tpu.memory_space<vmem>>, vector<1x32xf32>
    %4 = vector.broadcast %3 : vector<1x32xf32> to vector<16x32xf32>
    %5 = arith.mulf %2, %4 : vector<16x32xf32>
    %c0_4 = arith.constant 0 : index
    %c0_5 = arith.constant 0 : index
    %6 = vector.load %arg6[%c0_4, %c0_5] : memref<1x32xf32, #tpu.memory_space<vmem>>, vector<1x32xf32>
    %7 = vector.broadcast %6 : vector<1x32xf32> to vector<16x32xf32>
    %8 = arith.addf %5, %7 : vector<16x32xf32>
    %cst = arith.constant 0.000000e+00 : f32
    %9 = vector.broadcast %cst : f32 to vector<16x32xf32>
    %10 = arith.maximumf %8, %9 : vector<16x32xf32>
    %11 = arith.truncf %10 : vector<16x32xf32> to vector<16x32xbf16>
    %c0_6 = arith.constant 0 : index
    %c0_7 = arith.constant 0 : index
    %12 = vector.load %arg3[%c0_6, %c0_7] : memref<32x16xbf16, #tpu.memory_space<vmem>>, vector<32x16xbf16>
    %cst_8 = arith.constant dense<0.000000e+00> : vector<16x16xf32>
    %13 = tpu.matmul %11, %12, %cst_8 {dimension_numbers = #tpu.dot_dimension_numbers<[1], [0], [0], [1], [0, 0, 1, 1], [], []>} : vector<16x32xbf16>, vector<32x16xbf16>, vector<16x16xf32> -> vector<16x16xf32>
    %c0_9 = arith.constant 0 : index
    %c0_10 = arith.constant 0 : index
    %14 = vector.load %arg4[%c0_9, %c0_10] : memref<1x16xf32, #tpu.memory_space<vmem>>, vector<1x16xf32>
    %15 = vector.broadcast %14 : vector<1x16xf32> to vector<16x16xf32>
    %16 = arith.addf %13, %15 : vector<16x16xf32>
    %17 = arith.truncf %16 : vector<16x16xf32> to vector<16x16xbf16>
    %c0_11 = arith.constant 0 : index
    %c0_12 = arith.constant 0 : index
    %c0_13 = arith.constant 0 : index
    %18 = vector.load %arg7[%c0_11, %c0_12, %c0_13] : memref<1x16x16xbf16, #tpu.memory_space<vmem>>, vector<1x16x16xbf16>
    %19 = vector.shape_cast %18 : vector<1x16x16xbf16> to vector<16x16xbf16>
    %20 = vector.shape_cast %17 : vector<16x16xbf16> to vector<1x16x16xbf16>
    tpu.vector_store %arg7[%c0_11, %c0_12, %c0_13], %20 {strides = array<i32>} : memref<1x16x16xbf16, #tpu.memory_space<vmem>>, vector<1x16x16xbf16>,
    %c0_i32 = arith.constant 0 : i32
    %21 = arith.cmpi eq, %arg1, %c0_i32 : i32
    %22 = arith.extui %21 : i1 to i32
    %c0_i32_14 = arith.constant 0 : i32
    %23 = arith.cmpi ne, %22, %c0_i32_14 : i32
    scf.if %23 {
      %cst_29 = arith.constant 0.000000e+00 : f32
      %37 = vector.broadcast %cst_29 : f32 to vector<1x1x16xf32>
      %c0_30 = arith.constant 0 : index
      %c0_31 = arith.constant 0 : index
      %c0_32 = arith.constant 0 : index
      %38 = vector.load %arg8[%c0_30, %c0_31, %c0_32] : memref<1x1x16xf32, #tpu.memory_space<vmem>>, vector<1x1x16xf32>
      tpu.vector_store %arg8[%c0_30, %c0_31, %c0_32], %37 {strides = array<i32>} : memref<1x1x16xf32, #tpu.memory_space<vmem>>, vector<1x1x16xf32>,
      %cst_33 = arith.constant 0.000000e+00 : f32
      %39 = vector.broadcast %cst_33 : f32 to vector<1x1x16xf32>
      %c0_34 = arith.constant 0 : index
      %c0_35 = arith.constant 0 : index
      %c0_36 = arith.constant 0 : index
      %40 = vector.load %arg9[%c0_34, %c0_35, %c0_36] : memref<1x1x16xf32, #tpu.memory_space<vmem>>, vector<1x1x16xf32>
      tpu.vector_store %arg9[%c0_34, %c0_35, %c0_36], %39 {strides = array<i32>} : memref<1x1x16xf32, #tpu.memory_space<vmem>>, vector<1x1x16xf32>,
    } else {
    }
    %c0_15 = arith.constant 0 : index
    %c0_16 = arith.constant 0 : index
    %c0_17 = arith.constant 0 : index
    %24 = vector.load %arg8[%c0_15, %c0_16, %c0_17] : memref<1x1x16xf32, #tpu.memory_space<vmem>>, vector<1x1x16xf32>
    %cst_18 = arith.constant dense<0.000000e+00> : vector<16xf32>
    %25 = vector.multi_reduction <add>, %16, %cst_18 [0] : vector<16x16xf32> to vector<16xf32>
    %26 = vector.shape_cast %25 : vector<16xf32> to vector<1x16xf32>
    %27 = vector.shape_cast %26 : vector<1x16xf32> to vector<1x1x16xf32>
    %28 = arith.addf %24, %27 : vector<1x1x16xf32>
    %c0_19 = arith.constant 0 : index
    %c0_20 = arith.constant 0 : index
    %c0_21 = arith.constant 0 : index
    %29 = vector.load %arg8[%c0_19, %c0_20, %c0_21] : memref<1x1x16xf32, #tpu.memory_space<vmem>>, vector<1x1x16xf32>
    tpu.vector_store %arg8[%c0_19, %c0_20, %c0_21], %28 {strides = array<i32>} : memref<1x1x16xf32, #tpu.memory_space<vmem>>, vector<1x1x16xf32>,
    %c0_22 = arith.constant 0 : index
    %c0_23 = arith.constant 0 : index
    %c0_24 = arith.constant 0 : index
    %30 = vector.load %arg9[%c0_22, %c0_23, %c0_24] : memref<1x1x16xf32, #tpu.memory_space<vmem>>, vector<1x1x16xf32>
    %31 = arith.mulf %16, %16 : vector<16x16xf32>
    %cst_25 = arith.constant dense<0.000000e+00> : vector<16xf32>
    %32 = vector.multi_reduction <add>, %31, %cst_25 [0] : vector<16x16xf32> to vector<16xf32>
    %33 = vector.shape_cast %32 : vector<16xf32> to vector<1x16xf32>
    %34 = vector.shape_cast %33 : vector<1x16xf32> to vector<1x1x16xf32>
    %35 = arith.addf %30, %34 : vector<1x1x16xf32>
    %c0_26 = arith.constant 0 : index
    %c0_27 = arith.constant 0 : index
    %c0_28 = arith.constant 0 : index
    %36 = vector.load %arg9[%c0_26, %c0_27, %c0_28] : memref<1x1x16xf32, #tpu.memory_space<vmem>>, vector<1x1x16xf32>
    tpu.vector_store %arg9[%c0_26, %c0_27, %c0_28], %35 {strides = array<i32>} : memref<1x1x16xf32, #tpu.memory_space<vmem>>, vector<1x1x16xf32>,
    return
  }
  func.func @transform_0(%arg0: i32, %arg1: i32) -> (i32, i32, i32) {
    %c0_i32 = arith.constant 0 : i32
    %c0_i32_0 = arith.constant 0 : i32
    return %arg0, %arg1, %c0_i32 : i32, i32, i32
  }
  func.func @transform_1(%arg0: i32, %arg1: i32) -> (i32, i32) {
    %c0_i32 = arith.constant 0 : i32
    %c0_i32_0 = arith.constant 0 : i32
    %c0_i32_1 = arith.constant 0 : i32
    return %c0_i32, %c0_i32_0 : i32, i32
  }
  func.func @transform_2(%arg0: i32, %arg1: i32) -> (i32, i32) {
    %c0_i32 = arith.constant 0 : i32
    %c0_i32_0 = arith.constant 0 : i32
    %c0_i32_1 = arith.constant 0 : i32
    return %c0_i32, %c0_i32_0 : i32, i32
  }
  func.func @transform_3(%arg0: i32, %arg1: i32) -> (i32, i32) {
    %c0_i32 = arith.constant 0 : i32
    %c0_i32_0 = arith.constant 0 : i32
    %c0_i32_1 = arith.constant 0 : i32
    return %c0_i32, %c0_i32_0 : i32, i32
  }
  func.func @transform_4(%arg0: i32, %arg1: i32) -> (i32, i32) {
    %c0_i32 = arith.constant 0 : i32
    %c0_i32_0 = arith.constant 0 : i32
    %c0_i32_1 = arith.constant 0 : i32
    return %c0_i32, %c0_i32_0 : i32, i32
  }
  func.func @transform_5(%arg0: i32, %arg1: i32) -> (i32, i32, i32) {
    %c0_i32 = arith.constant 0 : i32
    %c0_i32_0 = arith.constant 0 : i32
    return %arg0, %arg1, %c0_i32 : i32, i32, i32
  }
  func.func @transform_6(%arg0: i32, %arg1: i32) -> (i32, i32, i32) {
    %c0_i32 = arith.constant 0 : i32
    %c0_i32_0 = arith.constant 0 : i32
    %c0_i32_1 = arith.constant 0 : i32
    return %arg0, %c0_i32, %c0_i32_0 : i32, i32, i32
  }
  func.func @transform_7(%arg0: i32, %arg1: i32) -> (i32, i32, i32) {
    %c0_i32 = arith.constant 0 : i32
    %c0_i32_0 = arith.constant 0 : i32
    %c0_i32_1 = arith.constant 0 : i32
    return %arg0, %c0_i32, %c0_i32_0 : i32, i32, i32
  }
}

module attributes {stable_mosaic.version = 11 : i64} {
  func.func @_affine_relu_kernel(%arg0: i32, %arg1: i32, %arg2: memref<1x16x16xbf16, #tpu.memory_space<vmem>>, %arg3: memref<1x16xf32, #tpu.memory_space<vmem>>, %arg4: memref<1x16xf32, #tpu.memory_space<vmem>>, %arg5: memref<1x16x16xf32, #tpu.memory_space<vmem>>) attributes {dimension_semantics = [#tpu.dimension_semantics<parallel>, #tpu.dimension_semantics<parallel>], iteration_bounds = array<i64: 2, 1>, scalar_prefetch = 0 : i64, scratch_operands = 0 : i64, tpu.core_type = #tpu.core_type<tc>, window_params = [{transform_indices = @transform_0, window_bounds = array<i64: 1, 16, 16>}, {pipeline_mode = #tpu.pipeline_mode<synchronous>, transform_indices = @transform_1, window_bounds = array<i64: 1, 16>}, {pipeline_mode = #tpu.pipeline_mode<synchronous>, transform_indices = @transform_2, window_bounds = array<i64: 1, 16>}, {transform_indices = @transform_3, window_bounds = array<i64: 1, 16, 16>}]} {
    %c0 = arith.constant 0 : index
    %c0_0 = arith.constant 0 : index
    %c0_1 = arith.constant 0 : index
    %0 = vector.load %arg2[%c0, %c0_0, %c0_1] : memref<1x16x16xbf16, #tpu.memory_space<vmem>>, vector<1x16x16xbf16>
    %1 = vector.shape_cast %0 : vector<1x16x16xbf16> to vector<16x16xbf16>
    %2 = arith.extf %1 : vector<16x16xbf16> to vector<16x16xf32>
    %c0_2 = arith.constant 0 : index
    %c0_3 = arith.constant 0 : index
    %3 = vector.load %arg3[%c0_2, %c0_3] : memref<1x16xf32, #tpu.memory_space<vmem>>, vector<1x16xf32>
    %4 = vector.broadcast %3 : vector<1x16xf32> to vector<16x16xf32>
    %5 = arith.mulf %2, %4 : vector<16x16xf32>
    %c0_4 = arith.constant 0 : index
    %c0_5 = arith.constant 0 : index
    %6 = vector.load %arg4[%c0_4, %c0_5] : memref<1x16xf32, #tpu.memory_space<vmem>>, vector<1x16xf32>
    %7 = vector.broadcast %6 : vector<1x16xf32> to vector<16x16xf32>
    %8 = arith.addf %5, %7 : vector<16x16xf32>
    %cst = arith.constant 0.000000e+00 : f32
    %9 = vector.broadcast %cst : f32 to vector<16x16xf32>
    %10 = arith.maximumf %8, %9 : vector<16x16xf32>
    %c0_6 = arith.constant 0 : index
    %c0_7 = arith.constant 0 : index
    %c0_8 = arith.constant 0 : index
    %11 = vector.load %arg5[%c0_6, %c0_7, %c0_8] : memref<1x16x16xf32, #tpu.memory_space<vmem>>, vector<1x16x16xf32>
    %12 = vector.shape_cast %11 : vector<1x16x16xf32> to vector<16x16xf32>
    %13 = vector.shape_cast %10 : vector<16x16xf32> to vector<1x16x16xf32>
    tpu.vector_store %arg5[%c0_6, %c0_7, %c0_8], %13 {strides = array<i32>} : memref<1x16x16xf32, #tpu.memory_space<vmem>>, vector<1x16x16xf32>,
    return
  }
  func.func @transform_0(%arg0: i32, %arg1: i32) -> (i32, i32, i32) {
    %c0_i32 = arith.constant 0 : i32
    %c0_i32_0 = arith.constant 0 : i32
    return %arg0, %arg1, %c0_i32 : i32, i32, i32
  }
  func.func @transform_1(%arg0: i32, %arg1: i32) -> (i32, i32) {
    %c0_i32 = arith.constant 0 : i32
    %c0_i32_0 = arith.constant 0 : i32
    %c0_i32_1 = arith.constant 0 : i32
    return %c0_i32, %c0_i32_0 : i32, i32
  }
  func.func @transform_2(%arg0: i32, %arg1: i32) -> (i32, i32) {
    %c0_i32 = arith.constant 0 : i32
    %c0_i32_0 = arith.constant 0 : i32
    %c0_i32_1 = arith.constant 0 : i32
    return %c0_i32, %c0_i32_0 : i32, i32
  }
  func.func @transform_3(%arg0: i32, %arg1: i32) -> (i32, i32, i32) {
    %c0_i32 = arith.constant 0 : i32
    %c0_i32_0 = arith.constant 0 : i32
    return %arg0, %arg1, %c0_i32 : i32, i32, i32
  }
}

</mosaic_0001>

<bundles_post_ra>
// kernel: pointnet_fp_forward.5
= control target key start
LH: loop header
LB: loop body
LE: loop exit
PB: predicated region body
PF: predicated region fallthrough
CT: control target
= control target key end

     0   :  { %s411_s12 = smov 0   ;;  %s413_s13 = smov 0   ;;  %s447_s0 = inlined_call_operand.vmem [shape: bf16[2,16,16], index: 0, kind: input, shape index: {}]   ;;  %s448_s1 = inlined_call_operand.vmem [shape: f32[1,16], index: 1, kind: input, shape index: {}]   ;;  %s449_s2 = inlined_call_operand.vmem [shape: f32[1,16], index: 2, kind: input, shape index: {}]   ;;  %s450_s3 = inlined_call_operand.vmem [shape: f32[2,16,16], index: 3, kind: output, shape index: {}]  }
   0x1   :  { %s415_s14 = smov 0  }
   0x2 LB: > { %s25_s15 = sadd.s32 1, %s385_s13  ;;  %p328_p0 = scmp.ge.s32.totalorder %s389_s14, 1  ;;  %s389_s14 = sphi %s415_s14, %s13_s14   ;;  %s385_s13 = sphi %s413_s13, %s452_s13   ;;  %s381_s12 = sphi %s411_s12, %s451_s12  }
   0x3   : > { %p27_p1 = scmp.ge.s32.totalorder %s25_s15, 2  ;;  %p158_p2 = scmp.lt.s32.totalorder %s389_s14, 3 }
   0x5   : > { %s454_s15 = smov (%p27_p1, %s25_s15), 0  ;;  %p159_p3 = pnand %p328_p0, %p158_p2 }
   0x6   : > { %p191_p4 = scmp.lt.s32.totalorder (!%p159_p3), %s381_s12, 1  ;;  %v333_v1 = vld [vmem:[%s448_s1] ss:$0 sm:$0xff] (!%p159_p3)  ;;  %vm234_vm0 = vcmask (!%p159_p3), 130048  }
   0x7   : > { %162 = sbr.rel (%p159_p3) target bundleno = 27 (0x1b), region = 32  ;;  %v334_v4 = vld [vmem:[%s449_s2] ss:$0 sm:$0xff] (!%p159_p3) }
   0xe   : > { %s456_s12 = smov (!%p191_p4, %s381_s12), 1 }
   0xf   : > { %s337_s16 = sshll.u32 %s456_s12, 3  ;;  %s338_s24 = sshll.u32 %s456_s12, 4 }
  0x10   : > { %s198_s19 = scalar_lea.vmem %s447_s0, %s337_s16  ;;  %s208_s27 = scalar_lea.vmem %s450_s3, %s338_s24 }
  0x11   : > { %v340_v0 = vld [vmem:[%s198_s19] sm:$0xff]  }
  0x12   : > { %v341_v2 = vunpack.c.l.bf16 %v340_v0  ;;  %v342_v3 = vunpack.c.h.bf16 %v340_v0 }
  0x14   : > { %v221_v5 = vmul.f32 %v341_v2, %v333_v1  ;;  %v222_v6 = vmul.f32 %v342_v3, %v333_v1 }
  0x16   : > { %v230_v7 = vadd.f32 %v334_v4, %v221_v5  ;;  %v231_v8 = vadd.f32 %v334_v4, %v222_v6 }
  0x18   : > { %v232_v9 = vmax.f32 %v230_v7, 0.0  ;;  %v233_v10 = vmax.f32 %v231_v8, 0.0 }
  0x1a   : > { %235 = vst.msk [vmem:[%s208_s27] sm:$0xff] %vm234_vm0, %v232_v9  ;;  %236 = vst.msk [vmem:[%s208_s27 + $0x8] sm:$0xff] %vm234_vm0, %v233_v10 }
  0x1b PF: > { %s13_s14 = sadd.s32 1, %s389_s14   ;;  %s451_s12 = smov %s385_s13 }
  0x1c   : > { %p10_p5 = scmp.ge.s32.totalorder %s13_s14, 4   ;;  %s452_s13 = smov %s454_s15 }
  0x1e   :  { %12 = sbr.rel (!%p10_p5) target bundleno = 2 (0x2), region = 62 }

// kernel: pointnet_fp_forward.4
= control target key start
LH: loop header
LB: loop body
LE: loop exit
PB: predicated region body
PF: predicated region fallthrough
CT: control target
= control target key end

     0   :  { %s744_s24 = smov 0   ;;  %s746_s25 = smov 0   ;;  %s817_s0 = inlined_call_operand.vmem [shape: bf16[2,16,32], index: 0, kind: input, shape index: {}]   ;;  %s818_s1 = inlined_call_operand.vmem [shape: bf16[32,16], index: 1, kind: input, shape index: {}]   ;;  %s819_s2 = inlined_call_operand.vmem [shape: f32[1,16], index: 2, kind: input, shape index: {}]   ;;  %s820_s3 = inlined_call_operand.vmem [shape: f32[1,32], index: 3, kind: input, shape index: {}]   ;;  %s821_s4 = inlined_call_operand.vmem [shape: f32[1,32], index: 4, kind: input, shape index: {}]   ;;  %s822_s5 = inlined_call_operand.vmem [shape: bf16[2,16,16], index: 5, kind: output, shape index: {0}]   ;;  %s823_s6 = inlined_call_operand.vmem [shape: f32[2,1,16], index: 6, kind: output, shape index: {1}]   ;;  %s824_s7 = inlined_call_operand.vmem [shape: f32[2,1,16], index: 7, kind: output, shape index: {2}]  }
   0x1   :  { %s748_s26 = smov 0  }
   0x2 LB: > { %s30_s27 = sadd.s32 1, %s696_s25  ;;  %p616_p0 = scmp.ge.s32.totalorder %s700_s26, 1  ;;  %s700_s26 = sphi %s748_s26, %s18_s26   ;;  %s696_s25 = sphi %s746_s25, %s826_s25   ;;  %s692_s24 = sphi %s744_s24, %s825_s24  }
   0x3   : > { %p32_p1 = scmp.ge.s32.totalorder %s30_s27, 2  ;;  %p263_p2 = scmp.lt.s32.totalorder %s700_s26, 3 }
   0x5   : > { %s828_s27 = smov (%p32_p1, %s30_s27), 0  ;;  %p264_p3 = pnand %p616_p0, %p263_p2 }
   0x6   : > { %p310_p4 = scmp.lt.s32.totalorder (!%p264_p3), %s692_s24, 1  ;;  %v676_v0 = vld [vmem:[%s818_s1] sm:$0xff] (!%p264_p3)   ;;  %v702_v1 = vmov (!%p264_p3), 0.0   ;;  %vm444_vm0 = vcmask (!%p264_p3), 122880   ;;  %v677_v2 = vld [vmem:[%s818_s1 + $0x8] sm:$0xff] (!%p264_p3)   ;;  %vm703_vm1 = vmmov (!%p264_p3), 0  }
   0x7   : > { %267 = sbr.rel (%p264_p3) target bundleno = 265 (0x109), region = 40  ;;  %642 = vmatprep.subr.bf16.mxu0 (!%p264_p3), %v702_v1  ;;  %646 = vmatprep.mubr.msk.bf16.mxu0 (!%p264_p3), %vm703_vm1, %v702_v1  ;;  %v621_v4 = vld [vmem:[%s820_s3] ss:$0 sm:$0xff] (!%p264_p3)  ;;  %vm384_vm2 = vcmask (!%p264_p3), 261120   ;;  %vm437_vm3 = vcmask (!%p264_p3), 125952   ;;  %vm448_vm4 = vcmask (!%p264_p3), 130048  }
   0x8   : > { %643 = vmatpush3.bf16.msra.mxu0 (!%p264_p3), %v676_v0  ;;  %v622_v7 = vld [vmem:[%s821_s4] ss:$0 sm:$0xff] (!%p264_p3) }
   0x9   : > { %644 = vmatprep.subr.bf16.mxu0 (!%p264_p3), %v702_v1  ;;  %v623_v15 = vld [vmem:[%s819_s2] ss:$0 sm:$0xff] (!%p264_p3) }
   0xc   : > { %645 = vmatpush3.bf16.msra.mxu0 (!%p264_p3), %v677_v2 }
   0xe   : > { %s830_s24 = smov (!%p310_p4, %s692_s24), 1 }
   0xf   : > { %s774_s11 = scalar_lea.vmem %s823_s6, %s830_s24  ;;  %s780_s14 = scalar_lea.vmem %s824_s7, %s830_s24 }
  0x10   : > { %445 = vst.msk [vmem:[%s774_s11] sm:$0x1] %vm444_vm0, %v702_v1  ;;  %446 = vst.msk [vmem:[%s780_s14] sm:$0x1] %vm444_vm0, %v702_v1  ;;  %s631_s15 = sshll.u32 %s830_s24, 3 }
  0x11   : > { %s317_s18 = scalar_lea.vmem %s817_s0, %s631_s15  ;;  %s327_s30 = scalar_lea.vmem %s822_s5, %s631_s15 }
  0x12   : > { %v636_v3 = vld [vmem:[%s317_s18] sm:$0xff]  }
  0x13   : > { %v637_v5 = vunpack.c.l.bf16 %v636_v3  ;;  %v638_v6 = vunpack.c.h.bf16 %v636_v3 }
  0x15   : > { %v347_v8 = vmul.f32 %v637_v5, %v621_v4  ;;  %v348_v9 = vmul.f32 %v638_v6, %v621_v4 }
  0x17   : > { %v356_v10 = vadd.f32 %v622_v7, %v347_v8  ;;  %v357_v11 = vadd.f32 %v622_v7, %v348_v9  ;;  %v447_v41 = vld [vmem:[%s774_s11] sm:$0x1] }
  0x18   : > { %v461_v44 = vld [vmem:[%s780_s14] sm:$0x1] }
  0x19   : > { %v358_v12 = vmax.f32 %v356_v10, 0.0  ;;  %v359_v13 = vmax.f32 %v357_v11, 0.0 }
  0x1b   : > { %v360_v14 = vpack.c.bf16 %v359_v13, %v358_v12 }
  0x1d   : > { %647 = vmatmul.mubr.msk.bf16.vlgmr.msra.gmra.mrb[0].mxu0 %vm384_vm2, %v360_v14 }
  0xf0   : > { %v422_v16 = vpop.f32.mrb[0].mxu0 }
  0xf1   : > { %v423_v17 = vadd.f32 %v623_v15, %v422_v16  ;;  %v648_v18 = vpop.f32.mrb[1].mxu0 }
  0xf2   : > { %v425_v19 = vpop.f32.mrb[2].mxu0 }
  0xf3   : > { %v633_v20 = vpack.c.bf16 %v423_v17, %v423_v17  ;;  %v462_v21 = vmul.f32 %v423_v17, %v423_v17  ;;  %v426_v22 = vadd.f32 %v623_v15, %v425_v19  ;;  %v649_v23 = vpop.f32.mrb[3].mxu0  ;;  %v449_v24 = vsel %vm448_vm4, %v423_v17, 0.0 }
  0xf5   : > { %438 = vst.msk [vmem:[%s327_s30] sm:$0xf] %vm437_vm3, %v633_v20  ;;  %v634_v25 = vpack.c.bf16 %v426_v22, %v426_v22  ;;  %v450_v26 = vsel %vm448_vm4, %v426_v22, 0.0  ;;  %v463_v27 = vmul.f32 %v426_v22, %v426_v22  ;;  %v464_v29 = vsel %vm448_vm4, %v462_v21, 0.0 }
  0xf6   : > { %v451_v28 = vadd.f32 %v450_v26, %v449_v24 }
  0xf7   : > { %439 = vst.msk [vmem:[%s327_s30 + $0x4] sm:$0xf] %vm437_vm3, %v634_v25  ;;  %v465_v30 = vsel %vm448_vm4, %v463_v27, 0.0 }
  0xf8   : > { %v452_v31 = vrot.slane %v451_v28, 4  ;;  %v466_v32 = vadd.f32 %v465_v30, %v464_v29 }
  0xfa   : > { %v453_v33 = vadd.f32 %v452_v31, %v451_v28  ;;  %v467_v34 = vrot.slane %v466_v32, 4 }
  0xfc   : > { %v454_v35 = vrot.slane %v453_v33, 2  ;;  %v468_v36 = vadd.f32 %v467_v34, %v466_v32 }
  0xfe   : > { %v455_v37 = vadd.f32 %v454_v35, %v453_v33  ;;  %v469_v38 = vrot.slane %v468_v36, 2 }
 0x100   : > { %v456_v39 = vrot.slane %v455_v37, 1  ;;  %v470_v40 = vadd.f32 %v469_v38, %v468_v36 }
 0x102   : > { %v457_v42 = vadd.f32 %v456_v39, %v455_v37  ;;  %v471_v43 = vrot.slane %v470_v40, 1 }
 0x104   : > { %v458_v45 = vadd.f32 %v457_v42, %v447_v41  ;;  %v472_v46 = vadd.f32 %v471_v43, %v470_v40 }
 0x106   : > { %460 = vst.msk [vmem:[%s774_s11] sm:$0x1] %vm444_vm0, %v458_v45  ;;  %v473_v47 = vadd.f32 %v472_v46, %v461_v44 }
 0x108   : > { %474 = vst.msk [vmem:[%s780_s14] sm:$0x1] %vm444_vm0, %v473_v47 }
 0x109 PF: > { %s18_s26 = sadd.s32 1, %s700_s26   ;;  %s825_s24 = smov %s696_s25 }
 0x10a   : > { %p15_p5 = scmp.ge.s32.totalorder %s18_s26, 4   ;;  %s826_s25 = smov %s828_s27 }
 0x10c   :  { %17 = sbr.rel (!%p15_p5) target bundleno = 2 (0x2), region = 98 }

// kernel: pointnet_fp_forward.3
= control target key start
LH: loop header
LB: loop body
LE: loop exit
PB: predicated region body
PF: predicated region fallthrough
CT: control target
= control target key end

     0   :  { %s1306_s30 = smov 0   ;;  %s1308_s10 = smov 0   ;;  %s1471_s0 = inlined_call_operand.vmem [shape: f32[2,16,3], index: 0, kind: input, shape index: {}]   ;;  %s1472_s1 = inlined_call_operand.vmem [shape: f32[2,3,8], index: 1, kind: input, shape index: {}]   ;;  %s1473_s2 = inlined_call_operand.vmem [shape: f32[2,8,8], index: 2, kind: input, shape index: {}]   ;;  %s1474_s3 = inlined_call_operand.vmem [shape: bf16[2,16,4], index: 3, kind: input, shape index: {}]   ;;  %s1475_s4 = inlined_call_operand.vmem [shape: bf16[4,32], index: 4, kind: input, shape index: {}]   ;;  %s1476_s5 = inlined_call_operand.vmem [shape: bf16[8,32], index: 5, kind: input, shape index: {}]   ;;  %s1477_s6 = inlined_call_operand.vmem [shape: f32[1,32], index: 6, kind: input, shape index: {}]   ;;  %s1478_s7 = inlined_call_operand.vmem [shape: bf16[2,16,32], index: 7, kind: output, shape index: {0}]   ;;  %s1479_s8 = inlined_call_operand.vmem [shape: f32[2,1,32], index: 8, kind: output, shape index: {1}]   ;;  %s1480_s9 = inlined_call_operand.vmem [shape: f32[2,1,32], index: 9, kind: output, shape index: {2}]  }
   0x1   :  { %s1310_s11 = smov 0  }
   0x2 LB: > { %s32_s12 = sadd.s32 1, %s1245_s10  ;;  %p1121_p0 = scmp.ge.s32.totalorder %s1249_s11, 1  ;;  %s1249_s11 = sphi %s1310_s11, %s20_s11   ;;  %s1245_s10 = sphi %s1308_s10, %s1482_s10   ;;  %s1241_s30 = sphi %s1306_s30, %s1481_s30  }
   0x3   : > { %p34_p1 = scmp.ge.s32.totalorder %s32_s12, 2  ;;  %p348_p2 = scmp.lt.s32.totalorder %s1249_s11, 3 }
   0x5   : > { %s1484_s12 = smov (%p34_p1, %s32_s12), 0  ;;  %p349_p3 = pnand %p1121_p0, %p348_p2 }
   0x6   : > { %p416_p4 = scmp.lt.s32.totalorder (!%p349_p3), %s1241_s30, 1  ;;  %v1251_v0 = vmov (!%p349_p3), 0   ;;  %v1252_v3 = vmov (!%p349_p3), 1   ;;  %v1253_v4 = vmov (!%p349_p3), 2   ;;  %v474_v5 = vlaneseq (!%p349_p3) }
   0x7   : > { %352 = sbr.rel (%p349_p3) target bundleno = 1534 (0x5fe), region = 48  ;;  %1206 = vset.pattern.permute.xlu1 (!%p349_p3), %v1251_v0  ;;  %1204 = vset.pattern.permute.xlu0 (!%p349_p3), %v1251_v0  ;;  %vm530_vm0 = vcmask (!%p349_p3), 64512   ;;  %v1254_v49 = vmov (!%p349_p3), 0.0   ;;  %vm790_vm13 = vcmask (!%p349_p3), 1041408   ;;  %vm838_vm14 = vcmask (!%p349_p3), 1043456  }
   0x8   : > { %v475_v6 = vshrl.u32 (!%p349_p3), %v474_v5, 7  ;;  %v521_v36 = vand.u32 (!%p349_p3), 127, %v474_v5  ;;  %1163 = vmatprep.subr.bf16.mxu1 (!%p349_p3), %v1254_v49  ;;  %vm1255_vm15 = vmmov (!%p349_p3), 0  }
   0x9   : > { %1165 = vmatprep.mubr.msk.bf16.mxu1 (!%p349_p3), %vm1255_vm15, %v1254_v49 }
   0xa   : > { %v494_v7 = vsub.s32 (!%p349_p3), 1, %v475_v6  ;;  %v476_v8 = vsub.s32 (!%p349_p3), 0, %v475_v6  ;;  %v512_v14 = vsub.s32 (!%p349_p3), 2, %v475_v6 }
   0xe   : > { %s1486_s30 = smov (!%p416_p4, %s1241_s30), 1 }
   0xf   : > { %s1146_s13 = sshll.u32 %s1486_s30, 4  ;;  %s1124_s17 = sshll.u32 %s1486_s30, 2 }
  0x10   : > { %s423_s16 = scalar_lea.vmem %s1471_s0, %s1146_s13  ;;  %s428_s20 = scalar_lea.vmem %s1472_s1, %s1124_s17 }
  0x11   : > { %v461_v1 = vld [vmem:[%s423_s16 + $0x8] sm:$0xff]  ;;  %v460_v2 = vld [vmem:[%s423_s16] sm:$0xff]  ;;  %s1400_s21 = sshll.u32 %s1486_s30, 3  ;;  %s1435_s19 = scalar_lea.vmem %s1479_s8, %s1486_s30 }
  0x12   : > { %471 = vperm.xlu1 %1206, %v461_v1   ;;  %466 = vperm.xlu0 %1204, %v460_v2   ;;  %v462_v9 = vld [vmem:[%s428_s20] sm:$0x7]  ;;  %s432_s24 = scalar_lea.vmem %s1473_s2, %s1400_s21  ;;  %s441_s27 = scalar_lea.vmem %s1474_s3, %s1400_s21 }
  0x13   : > { %v495_v12 = vrot.slane %v462_v9, %v494_v7  ;;  %v477_v13 = vrot.slane %v462_v9, %v476_v8  ;;  %v513_v21 = vrot.slane %v462_v9, %v512_v14  ;;  %s1441_s23 = scalar_lea.vmem %s1480_s9, %s1486_s30 }
  0x16   : > { %1207 = vset.pattern.permute.xlu1 %v1252_v3  ;;  %1205 = vset.pattern.permute.xlu0 %v1252_v3 }
  0x17   : > { %489 = vperm.xlu1 %1207, %v461_v1   ;;  %485 = vperm.xlu0 %1205, %v460_v2  }
  0x1b   : > { %1208 = vset.pattern.permute.xlu1 %v1253_v4  ;;  %1209 = vset.pattern.permute.xlu0 %v1253_v4 }
  0x1c   : > { %503 = vperm.xlu1 %1208, %v460_v2   ;;  %507 = vperm.xlu0 %1209, %v461_v1  }
  0x91   : > { %v472_v10 = vpop.permute.xlu1 %471  ;;  %v467_v11 = vpop.permute.xlu0 %466 }
  0x92   : > { %v479_v19 = vsub.f32 %v472_v10, %v477_v13  ;;  %v478_v20 = vsub.f32 %v467_v11, %v477_v13 }
  0x94   : > { %v481_v26 = vmul.f32 %v479_v19, %v479_v19  ;;  %v480_v27 = vmul.f32 %v478_v20, %v478_v20 }
  0x96   : > { %v490_v15 = vpop.permute.xlu1 %489  ;;  %v486_v16 = vpop.permute.xlu0 %485 }
  0x97   : > { %v497_v17 = vsub.f32 %v490_v15, %v495_v12  ;;  %v496_v18 = vsub.f32 %v486_v16, %v495_v12 }
  0x99   : > { %v499_v22 = vmul.f32 %v497_v17, %v497_v17  ;;  %v498_v23 = vmul.f32 %v496_v18, %v496_v18 }
  0x9b   : > { %v504_v24 = vpop.permute.xlu1 %503  ;;  %v508_v25 = vpop.permute.xlu0 %507  ;;  %v501_v30 = vadd.f32 %v499_v22, %v481_v26  ;;  %v500_v31 = vadd.f32 %v498_v23, %v480_v27 }
  0x9c   : > { %v514_v28 = vsub.f32 %v504_v24, %v513_v21  ;;  %v515_v29 = vsub.f32 %v508_v25, %v513_v21 }
  0x9e   : > { %v516_v32 = vmul.f32 %v514_v28, %v514_v28  ;;  %v517_v33 = vmul.f32 %v515_v29, %v515_v29 }
  0xa0   : > { %v518_v34 = vadd.f32 %v516_v32, %v500_v31  ;;  %v519_v35 = vadd.f32 %v517_v33, %v501_v30 }
  0xa2   : > { %v524_v37 = vshra.s32 %v518_v34, 3  ;;  %v525_v38 = vshra.s32 %v519_v35, 3 }
  0xa4   : > { %v526_v39 = vshll.u32 %v524_v37, 3  ;;  %v527_v40 = vshll.u32 %v525_v38, 3 }
  0xa6   : > { %v1334_v41 = vor.u32 %v526_v39, %v521_v36  ;;  %v1336_v42 = vor.u32 %v527_v40, %v521_v36 }
  0xa8   : > { %v531_v43 = vsel %vm530_vm0, %v1334_v41, 2147483647  ;;  %v546_v44 = vsel %vm530_vm0, %v1336_v42, 2147483647 }
  0xa9   : > { %v533_v45 = vshra.s32 %v531_v43, 16  ;;  %v548_v46 = vshra.s32 %v546_v44, 16  ;;  %v532_v50 = vand.u32 65535, %v531_v43  ;;  %v547_v51 = vand.u32 65535, %v546_v44 }
  0xab   : > { %v535_v47 = vcvt.s32.f32 %v533_v45  ;;  %v550_v48 = vcvt.s32.f32 %v548_v46  ;;  %v534_v54 = vcvt.s32.f32 %v532_v50  ;;  %v549_v55 = vcvt.s32.f32 %v547_v51 }
  0xad   : > { %536 = vmin.xlane.f32.xlu1 %v535_v47  ;;  %551 = vmin.xlane.f32.xlu0 %v550_v48 }
 0x13a   : > { %v537_v52 = vpop.xlane.xlu1 %536  ;;  %v552_v53 = vpop.xlane.xlu0 %551 }
 0x13b   : > { %vm538_vm1 = vcmp.eq.f32.partialorder %v535_v47, %v537_v52  ;;  %vm553_vm2 = vcmp.eq.f32.partialorder %v550_v48, %v552_v53  ;;  %v543_v58 = vcvt.f32.s32 %v537_v52  ;;  %v558_v59 = vcvt.f32.s32 %v552_v53 }
 0x13c   : > { %v539_v56 = vsel %vm538_vm1, %v534_v54, inf  ;;  %v554_v57 = vsel %vm553_vm2, %v549_v55, inf  ;;  %vm786_vm1 = vcmask 31744   ;;  %vm907_vm2 = vcmask 253952  }
 0x13d   : > { %540 = vmin.xlane.f32.xlu1 %v539_v56  ;;  %555 = vmin.xlane.f32.xlu0 %v554_v57  ;;  %v544_v62 = vshll.u32 %v543_v58, 16  ;;  %v559_v63 = vshll.u32 %v558_v59, 16  ;;  %908 = vst.msk [vmem:[%s1435_s19] sm:$0x1] %vm907_vm2, %v1254_v49  ;;  %909 = vst.msk [vmem:[%s1441_s23] sm:$0x1] %vm907_vm2, %v1254_v49 }
 0x1ca   : > { %v541_v60 = vpop.xlane.xlu1 %540  ;;  %v556_v61 = vpop.xlane.xlu0 %555 }
 0x1cb   : > { %v542_v0 = vcvt.f32.s32 %v541_v60  ;;  %v557_v1 = vcvt.f32.s32 %v556_v61 }
 0x1cd   : > { %v1343_v2 = vadd.s32 %v544_v62, %v542_v0  ;;  %v1345_v3 = vadd.s32 %v559_v63, %v557_v1 }
 0x1cf   : > { %vm561_vm3 = vcmp.eq.s32.totalorder %v1334_v41, %v1343_v2  ;;  %vm562_vm4 = vcmp.eq.s32.totalorder %v1336_v42, %v1345_v3  ;;  %v563_v20 = vshra.s32 %v1343_v2, 3  ;;  %v564_v23 = vshra.s32 %v1345_v3, 3 }
 0x1d0   : > { %v1355_v4 = vsel %vm561_vm3, 2147483647, %v1334_v41  ;;  %v1361_v5 = vsel %vm562_vm4, 2147483647, %v1336_v42  ;;  %v1130_v56 = vsel %vm561_vm3, 1.0, %v1254_v49  ;;  %v1131_v59 = vsel %vm562_vm4, 1.0, %v1254_v49 }
 0x1d1   : > { %v585_v6 = vsel %vm530_vm0, %v1355_v4, 2147483647  ;;  %v600_v7 = vsel %vm530_vm0, %v1361_v5, 2147483647  ;;  %v565_v24 = vshll.u32 %v563_v20, 3  ;;  %v566_v31 = vshll.u32 %v564_v23, 3 }
 0x1d2   : > { %v587_v8 = vshra.s32 %v585_v6, 16  ;;  %v602_v9 = vshra.s32 %v600_v7, 16  ;;  %v586_v12 = vand.u32 65535, %v585_v6  ;;  %v601_v13 = vand.u32 65535, %v600_v7 }
 0x1d3   : > { %v569_v34 = vmax.f32 %v565_v24, 1e-10  ;;  %v570_v37 = vmax.f32 %v566_v31, 1e-10  ;;  %vm911_vm3 = vcmask 261120  }
 0x1d4   : > { %v589_v10 = vcvt.s32.f32 %v587_v8  ;;  %v604_v11 = vcvt.s32.f32 %v602_v9  ;;  %v588_v16 = vcvt.s32.f32 %v586_v12  ;;  %v603_v17 = vcvt.s32.f32 %v601_v13 }
 0x1d5   : > { %1211 = vrcp.f32 %v569_v34 }
 0x1d6   : > { %590 = vmin.xlane.f32.xlu1 %v589_v10  ;;  %605 = vmin.xlane.f32.xlu0 %v604_v11  ;;  %1213 = vrcp.f32 %v570_v37 }
 0x1df   : > { %v1212_v53 = vpop.eup %1211 }
 0x1e0   : > { %v1214_v54 = vpop.eup %1213  ;;  %v577_v61 = vmul.f32 %v1212_v53, %v1130_v56 }
 0x1e1   : > { %v578_v63 = vmul.f32 %v1214_v54, %v1131_v59 }
 0x263   : > { %v591_v14 = vpop.xlane.xlu1 %590  ;;  %v606_v15 = vpop.xlane.xlu0 %605 }
 0x264   : > { %vm592_vm5 = vcmp.eq.f32.partialorder %v589_v10, %v591_v14  ;;  %vm607_vm6 = vcmp.eq.f32.partialorder %v604_v11, %v606_v15  ;;  %v597_v21 = vcvt.f32.s32 %v591_v14  ;;  %v612_v22 = vcvt.f32.s32 %v606_v15 }
 0x265   : > { %v593_v18 = vsel %vm592_vm5, %v588_v16, inf  ;;  %v608_v19 = vsel %vm607_vm6, %v603_v17, inf }
 0x266   : > { %594 = vmin.xlane.f32.xlu1 %v593_v18  ;;  %609 = vmin.xlane.f32.xlu0 %v608_v19  ;;  %v598_v27 = vshll.u32 %v597_v21, 16  ;;  %v613_v28 = vshll.u32 %v612_v22, 16 }
 0x2f3   : > { %v595_v25 = vpop.xlane.xlu1 %594  ;;  %v610_v26 = vpop.xlane.xlu0 %609 }
 0x2f4   : > { %v596_v29 = vcvt.f32.s32 %v595_v25  ;;  %v611_v30 = vcvt.f32.s32 %v610_v26 }
 0x2f6   : > { %v599_v32 = vadd.s32 %v598_v27, %v596_v29  ;;  %v614_v33 = vadd.s32 %v613_v28, %v611_v30 }
 0x2f8   : > { %vm615_vm7 = vcmp.eq.s32.totalorder %v1355_v4, %v599_v32  ;;  %v617_v35 = vshra.s32 %v599_v32, 3  ;;  %vm616_vm8 = vcmp.eq.s32.totalorder %v1361_v5, %v614_v33  ;;  %v618_v36 = vshra.s32 %v614_v33, 3 }
 0x2f9   : > { %v1374_v38 = vsel %vm615_vm7, 2147483647, %v1355_v4  ;;  %v1379_v39 = vsel %vm616_vm8, 2147483647, %v1361_v5  ;;  %v1132_v57 = vsel %vm615_vm7, 1.0, %v1254_v49  ;;  %v1133_v60 = vsel %vm616_vm8, 1.0, %v1254_v49 }
 0x2fa   : > { %v619_v40 = vshll.u32 %v617_v35, 3  ;;  %v620_v43 = vshll.u32 %v618_v36, 3  ;;  %v639_v44 = vsel %vm530_vm0, %v1374_v38, 2147483647  ;;  %v654_v45 = vsel %vm530_vm0, %v1379_v39, 2147483647 }
 0x2fb   : > { %v641_v46 = vshra.s32 %v639_v44, 16  ;;  %v656_v47 = vshra.s32 %v654_v45, 16  ;;  %v640_v2 = vand.u32 65535, %v639_v44  ;;  %v655_v4 = vand.u32 65535, %v654_v45  ;;  %v463_v5 = vld [vmem:[%s432_s24] sm:$0xff] }
 0x2fc   : > { %v623_v48 = vmax.f32 %v619_v40, 1e-10  ;;  %v624_v50 = vmax.f32 %v620_v43, 1e-10  ;;  %1158 = vmatprep.subr.mxu0 %v463_v5  ;;  %v777_v43 = vld [vmem:[%s1476_s5] sm:$0xf] }
 0x2fd   : > { %v643_v51 = vcvt.s32.f32 %v641_v46  ;;  %v658_v52 = vcvt.s32.f32 %v656_v47  ;;  %v642_v8 = vcvt.s32.f32 %v640_v2  ;;  %v657_v9 = vcvt.s32.f32 %v655_v4  ;;  %1159 = vmatpush3.msra.mxu0 %v463_v5 }
 0x2fe   : > { %1215 = vrcp.f32 %v623_v48  ;;  %1169 = vmatprep.subr.bf16.mxu0 %v1254_v49  ;;  %v840_v44 = vsel %vm838_vm14, %v777_v43, 0 }
 0x2ff   : > { %1217 = vrcp.f32 %v624_v50  ;;  %644 = vmin.xlane.f32.xlu1 %v643_v51  ;;  %659 = vmin.xlane.f32.xlu0 %v658_v52 }
 0x308   : > { %v1216_v55 = vpop.eup %1215 }
 0x309   : > { %v1218_v58 = vpop.eup %1217  ;;  %v631_v62 = vmul.f32 %v1216_v55, %v1132_v57  ;;  %v635_v26 = vadd.f32 %v1216_v55, %v1212_v53 }
 0x30a   : > { %v632_v41 = vmul.f32 %v1218_v58, %v1133_v60  ;;  %v636_v29 = vadd.f32 %v1218_v58, %v1214_v54  ;;  %v1141_v58 = vld [vmem:[%s1477_s6] ss:$0 sm:$0xff] }
 0x30b   : > { %v633_v0 = vadd.f32 %v631_v62, %v577_v61 }
 0x30c   : > { %v634_v1 = vadd.f32 %v632_v41, %v578_v63 }
 0x38c   : > { %v645_v6 = vpop.xlane.xlu1 %644  ;;  %v660_v7 = vpop.xlane.xlu0 %659 }
 0x38d   : > { %vm646_vm9 = vcmp.eq.f32.partialorder %v643_v51, %v645_v6  ;;  %vm661_vm10 = vcmp.eq.f32.partialorder %v658_v52, %v660_v7  ;;  %v651_v10 = vcvt.f32.s32 %v645_v6  ;;  %v666_v11 = vcvt.f32.s32 %v660_v7 }
 0x38e   : > { %v647_v42 = vsel %vm646_vm9, %v642_v8, inf  ;;  %v662_v3 = vsel %vm661_vm10, %v657_v9, inf }
 0x38f   : > { %648 = vmin.xlane.f32.xlu1 %v647_v42  ;;  %663 = vmin.xlane.f32.xlu0 %v662_v3  ;;  %v652_v14 = vshll.u32 %v651_v10, 16  ;;  %v667_v15 = vshll.u32 %v666_v11, 16 }
 0x41c   : > { %v649_v12 = vpop.xlane.xlu1 %648  ;;  %v664_v13 = vpop.xlane.xlu0 %663 }
 0x41d   : > { %v650_v16 = vcvt.f32.s32 %v649_v12  ;;  %v665_v17 = vcvt.f32.s32 %v664_v13 }
 0x41f   : > { %v653_v18 = vadd.s32 %v652_v14, %v650_v16  ;;  %v668_v19 = vadd.s32 %v667_v15, %v665_v17 }
 0x421   : > { %v671_v20 = vshra.s32 %v653_v18, 3  ;;  %v672_v21 = vshra.s32 %v668_v19, 3  ;;  %vm669_vm11 = vcmp.eq.s32.totalorder %v1374_v38, %v653_v18  ;;  %vm670_vm12 = vcmp.eq.s32.totalorder %v1379_v39, %v668_v19  ;;  %v780_v38 = vld [vmem:[%s1475_s4] sm:$0x3] }
 0x422   : > { %v1134_v28 = vsel %vm669_vm11, 1.0, %v1254_v49  ;;  %v1135_v31 = vsel %vm670_vm12, 1.0, %v1254_v49  ;;  %v1210_v39 = vld [vmem:[%s441_s27] sm:$0xff]   ;;  %v792_v40 = vsel %vm790_vm13, %v780_v38, 0  ;;  %s451_s27 = scalar_lea.vmem %s1478_s7, %s1400_s21 }
 0x423   : > { %v673_v22 = vshll.u32 %v671_v20, 3  ;;  %v674_v23 = vshll.u32 %v672_v21, 3  ;;  %1164 = vmatpush3.bf16.msra.mxu1 %v792_v40  ;;  %v910_v18 = vld [vmem:[%s1435_s19] sm:$0x1] }
 0x424   : > { %v924_v21 = vld [vmem:[%s1441_s23] sm:$0x1] }
 0x425   : > { %v677_v24 = vmax.f32 %v673_v22, 1e-10  ;;  %v678_v25 = vmax.f32 %v674_v23, 1e-10 }
 0x426   : > { %1166 = vmatmul.mubr.msk.bf16.vlgmr.msra.gmra.mrb[0].mxu1 %vm786_vm1, %v1210_v39 }
 0x427   : > { %1219 = vrcp.f32 %v677_v24 }
 0x428   : > { %1221 = vrcp.f32 %v678_v25 }
 0x431   : > { %v1220_v27 = vpop.eup %1219 }
 0x432   : > { %v1222_v30 = vpop.eup %1221  ;;  %v685_v32 = vmul.f32 %v1220_v27, %v1134_v28  ;;  %v689_v33 = vadd.f32 %v1220_v27, %v635_v26 }
 0x433   : > { %v686_v34 = vmul.f32 %v1222_v30, %v1135_v31  ;;  %v690_v35 = vadd.f32 %v1222_v30, %v636_v29 }
 0x434   : > { %v687_v36 = vadd.f32 %v685_v32, %v633_v0 }
 0x435   : > { %v688_v37 = vadd.f32 %v686_v34, %v634_v1  ;;  %1223 = vrcp.f32 %v690_v35 }
 0x436   : > { %1160 = vmatprep.mubr.msk.f32.mxu0 %vm530_vm0, %v687_v36  ;;  %1225 = vrcp.f32 %v689_v33 }
 0x437   : > { %1161 = vmatmul.mubr.msk.f32.vlgmr.msra.gmra.mrb[0].mxu0 %vm530_vm0, %v688_v37 }
 0x438   : > { %1171 = vmatprep.mubr.msk.bf16.mxu0 %vm1255_vm15, %v1254_v49  ;;  %1170 = vmatpush3.bf16.msra.mxu0 %v840_v44 }
 0x43f   : > { %v1224_v45 = vpop.eup %1223 }
 0x440   : > { %v1226_v47 = vpop.eup %1225 }
 0x4f9   : > { %v828_v53 = vpop.f32.mrb[0].mxu1 }
 0x4fa   : > { %v1167_v54 = vpop.f32.mrb[1].mxu1 }
 0x4fb   : > { %v831_v55 = vpop.f32.mrb[2].mxu1 }
 0x4fc   : > { %v1168_v56 = vpop.f32.mrb[3].mxu1 }
 0x50a   : > { %v1162_v46 = vpop.f32.mrb[0].mxu0 }
 0x50b   : > { %v775_v48 = vmul.f32 %v1224_v45, %v1162_v46  ;;  %v763_v50 = vpop.f32.mrb[1].mxu0 }
 0x50c   : > { %v774_v51 = vmul.f32 %v1226_v47, %v763_v50 }
 0x50e   : > { %v776_v52 = vpack.c.bf16 %v775_v48, %v774_v51 }
 0x510   : > { %1172 = vmatmul.mubr.msk.bf16.vlgmr.msra.gmra.mrb[4].mxu0 %vm530_vm0, %v776_v52  ;;  %vm900_vm0 = vcmask 257024  }
 0x5e3   : > { %v876_v57 = vpop.f32.mrb[4].mxu0 }
 0x5e4   : > { %v877_v59 = vadd.f32 %v876_v57, %v828_v53  ;;  %v1173_v60 = vpop.f32.mrb[5].mxu0 }
 0x5e5   : > { %v879_v61 = vpop.f32.mrb[6].mxu0 }
 0x5e6   : > { %v890_v62 = vadd.f32 %v1141_v58, %v877_v59  ;;  %v880_v63 = vadd.f32 %v879_v61, %v831_v55  ;;  %v1174_v41 = vpop.f32.mrb[7].mxu0 }
 0x5e8   : > { %v1149_v0 = vpack.c.bf16 %v890_v62, %v890_v62  ;;  %v925_v1 = vmul.f32 %v890_v62, %v890_v62  ;;  %v891_v49 = vadd.f32 %v1141_v58, %v880_v63  ;;  %v912_v2 = vsel %vm911_vm3, %v890_v62, 0.0 }
 0x5ea   : > { %901 = vst.msk [vmem:[%s451_s27] sm:$0xf] %vm900_vm0, %v1149_v0  ;;  %v1150_v4 = vpack.c.bf16 %v891_v49, %v891_v49  ;;  %v913_v6 = vsel %vm911_vm3, %v891_v49, 0.0  ;;  %v926_v7 = vmul.f32 %v891_v49, %v891_v49  ;;  %v927_v9 = vsel %vm911_vm3, %v925_v1, 0.0 }
 0x5eb   : > { %v914_v8 = vadd.f32 %v913_v6, %v912_v2 }
 0x5ec   : > { %902 = vst.msk [vmem:[%s451_s27 + $0x4] sm:$0xf] %vm900_vm0, %v1150_v4  ;;  %v928_v42 = vsel %vm911_vm3, %v926_v7, 0.0 }
 0x5ed   : > { %v915_v3 = vrot.slane %v914_v8, 4  ;;  %v929_v5 = vadd.f32 %v928_v42, %v927_v9 }
 0x5ef   : > { %v916_v10 = vadd.f32 %v915_v3, %v914_v8  ;;  %v930_v11 = vrot.slane %v929_v5, 4 }
 0x5f1   : > { %v917_v12 = vrot.slane %v916_v10, 2  ;;  %v931_v13 = vadd.f32 %v930_v11, %v929_v5 }
 0x5f3   : > { %v918_v14 = vadd.f32 %v917_v12, %v916_v10  ;;  %v932_v15 = vrot.slane %v931_v13, 2 }
 0x5f5   : > { %v919_v16 = vrot.slane %v918_v14, 1  ;;  %v933_v17 = vadd.f32 %v932_v15, %v931_v13 }
 0x5f7   : > { %v920_v19 = vadd.f32 %v919_v16, %v918_v14  ;;  %v934_v20 = vrot.slane %v933_v17, 1 }
 0x5f9   : > { %v921_v22 = vadd.f32 %v920_v19, %v910_v18  ;;  %v935_v23 = vadd.f32 %v934_v20, %v933_v17 }
 0x5fb   : > { %923 = vst.msk [vmem:[%s1435_s19] sm:$0x1] %vm907_vm2, %v921_v22  ;;  %v936_v24 = vadd.f32 %v935_v23, %v924_v21 }
 0x5fd   : > { %937 = vst.msk [vmem:[%s1441_s23] sm:$0x1] %vm907_vm2, %v936_v24 }
 0x5fe PF: > { %s20_s11 = sadd.s32 1, %s1249_s11   ;;  %s1481_s30 = smov %s1245_s10 }
 0x5ff   : > { %p17_p5 = scmp.ge.s32.totalorder %s20_s11, 4   ;;  %s1482_s10 = smov %s1484_s12 }
 0x601   :  { %19 = sbr.rel (!%p17_p5) target bundleno = 2 (0x2), region = 115 }

</bundles_post_ra>
